<compile_context>
chip_gen: v5e
topology: v5e:2x2
jax: 0.10.0
libtpu: 0.0.40
codegen_flags: <defaults>
</compile_context>

<pallas_src>
import functools

import jax
import jax.numpy as jnp
from jax import lax
from jax.experimental import pallas as pl
from jax.experimental.pallas import tpu as pltpu


# --------------------------------------------------------------------------
# Fused kernel: expand(1x1) -> ReLU -> linear(1x1) -> conv(ks x ks) -> + x
# --------------------------------------------------------------------------
def _wdsr_block_kernel(xlo_ref, xc_ref, xhi_ref, w1_ref, b1_ref, w2_ref, b2_ref,
                       w3_ref, b3_ref, o_ref, xext_ref, *, ks):
    p = ks // 2
    c_in = xlo_ref.shape[1]
    hr = xlo_ref.shape[2]          # rows in each halo fine-block
    W = xlo_ref.shape[3]           # image width
    TB = xc_ref.shape[2]           # flattened tokens in this row-block (rbh * W)
    pW = p * W
    L = TB + 2 * pW + 2 * p        # slack | lo halo | block | hi halo | slack
    c_out = o_ref.shape[1]

    r = pl.program_id(1)
    r_last = pl.num_programs(1) - 1

    x_c = xc_ref[0].astype(jnp.float32)                       # (C, TB), lane-dense

    # ---- assemble halo-extended, flattened stage-1 input in VMEM ------------
    xext_ref[:, 0:p] = jnp.zeros((c_in, p), jnp.float32)
    xext_ref[:, L - p:L] = jnp.zeros((c_in, p), jnp.float32)
    for j in range(p):
        xext_ref[:, p + j * W:p + (j + 1) * W] = (
            xlo_ref[0, :, hr - p + j, :].astype(jnp.float32))
        xext_ref[:, p + pW + TB + j * W:p + pW + TB + (j + 1) * W] = (
            xhi_ref[0, :, j, :].astype(jnp.float32))
    xext_ref[:, p + pW:p + pW + TB] = x_c
    x_ext = xext_ref[...]                                      # (C, L)

    # ---- stage 1: both 1x1 convs as MXU matmuls ------------------------------
    t1 = jnp.dot(w1_ref[...], x_ext, preferred_element_type=jnp.float32) + b1_ref[...]
    t1 = jnp.maximum(t1, 0.0)                                  # ReLU
    t2 = jnp.dot(w2_ref[...], t1, preferred_element_type=jnp.float32) + b2_ref[...]

    # ---- vertical SAME padding: zero t2 halo rows at image top / bottom ------
    lane = lax.broadcasted_iota(jnp.int32, (1, L), 1)
    lo_halo = (lane >= p) & (lane < p + pW)
    hi_halo = (lane >= p + pW + TB) & (lane < p + pW + TB + pW)
    kill = ((r == 0) & lo_halo) | ((r == r_last) & hi_halo)
    t2 = jnp.where(kill, 0.0, t2)                              # (C2, L)

    # ---- ks x ks conv as ks^2 shifted MXU matmuls + column edge masks --------
    col = lax.broadcasted_iota(jnp.int32, (1, TB), 1) % W
    acc = jnp.zeros((c_out, TB), jnp.float32)
    for dy in range(ks):
        for dx in range(ks):
            s = dy * W + dx
            tap = t2[:, s:s + TB]                              # (C2, TB) lane shift
            d = dx - p
            if d != 0:                                         # horizontal zero pad
                valid = (col + d >= 0) & (col + d < W)
                tap = jnp.where(valid, tap, 0.0)
            acc = acc + jnp.dot(w3_ref[dy, dx], tap,
                                preferred_element_type=jnp.float32)

    # ---- bias + residual, lane-dense store ------------------------------------
    o_ref[0] = (acc + b3_ref[...] + x_c).astype(o_ref.dtype)


# --------------------------------------------------------------------------
# Wrapper
# --------------------------------------------------------------------------
def _pick_row_block(h, w, target_tokens=2048):
    """Rows per block: multiple of 8, divides H, lane-aligned flat block."""
    cands = [r for r in range(8, h, 8) if h % r == 0 and (r * w) % 128 == 0]
    if not cands:
        return h
    small = [r for r in cands if r * w <= target_tokens]
    return max(small) if small else min(cands)


def wdsr_b_block(x, params, *, kernel_size):
    """x: (N, C, H, W) float32 (NCHW). Returns (N, C, H, W)."""
    w1, b1, w2, b2, w3, b3 = params                 # conv-layout (O, I, kh, kw)
    n, c, h, w = x.shape
    c1 = w1.shape[0]
    c2 = w2.shape[0]
    ks = kernel_size
    assert ks % 2 == 1 and ks >= 3, "kernel_size must be odd and >= 3"
    p = ks // 2
    assert p < h, "kernel taller than image not supported"

    rbh = _pick_row_block(h, w)
    if rbh < h and p > 8:                           # halo must fit in one fine block
        rbh = h
    hr = 8 if rbh < h else h                        # halo fine-block height (rows)
    kl = rbh // hr                                  # fine blocks per row-block
    nf = h // hr                                    # fine blocks along H
    R = h // rbh                                    # row-blocks per image
    tb = rbh * w                                    # flat tokens per block
    T = h * w
    L = tb + 2 * p * w + 2 * p

    x3 = x.reshape(n, c, T)                         # free reshape, lane-dense view
    w1m = w1[:, :, 0, 0]                            # (C1, C)
    w2m = w2[:, :, 0, 0]                            # (C2, C1)
    w3r = jnp.transpose(w3, (2, 3, 0, 1))           # (ks, ks, C, C2) per-tap matrices
    b1c = b1.reshape(c1, 1)
    b2c = b2.reshape(c2, 1)
    b3c = b3.reshape(c, 1)

    kern = functools.partial(_wdsr_block_kernel, ks=ks)

    out = pl.pallas_call(
        kern,
        out_shape=jax.ShapeDtypeStruct((n, c, T), jnp.float32),
        grid=(n, R),
        in_specs=[
            # low halo rows (only the last p rows are used), NCHW view
            pl.BlockSpec((1, c, hr, w),
                         lambda i, r: (i, 0, jnp.maximum(r * kl - 1, 0), 0)),
            # current row-block, flattened (N, C, H*W) view -> lane-dense
            pl.BlockSpec((1, c, tb), lambda i, r: (i, 0, r)),
            # high halo rows (only the first p rows are used), NCHW view
            pl.BlockSpec((1, c, hr, w),
                         lambda i, r: (i, 0, jnp.minimum((r + 1) * kl, nf - 1), 0)),
            pl.BlockSpec((c1, c), lambda i, r: (0, 0)),
            pl.BlockSpec((c1, 1), lambda i, r: (0, 0)),
            pl.BlockSpec((c2, c1), lambda i, r: (0, 0)),
            pl.BlockSpec((c2, 1), lambda i, r: (0, 0)),
            pl.BlockSpec((ks, ks, c, c2), lambda i, r: (0, 0, 0, 0)),
            pl.BlockSpec((c, 1), lambda i, r: (0, 0)),
        ],
        out_specs=pl.BlockSpec((1, c, tb), lambda i, r: (i, 0, r)),
        scratch_shapes=[pltpu.VMEM((c, L), jnp.float32)],
        compiler_params=pltpu.CompilerParams(
            dimension_semantics=("parallel", "parallel")),
    )(x, x3, x, w1m, b1c, w2m, b2c, w3r, b3c)
    return out.reshape(n, c, h, w)


# --------------------------------------------------------------------------
# Deterministic parameter init (mirrors Block.__init__ semantics, width_search=False)
# --------------------------------------------------------------------------
def init_params(key, num_residual_units, kernel_size, res_scale=1.0):
    expand, linear = 6, 0.84
    c = num_residual_units
    c1 = c * expand
    c2 = int(c * linear)
    k1, k2, k3 = jax.random.split(key, 3)
    v1 = jax.random.normal(k1, (c1, c, 1, 1), jnp.float32)
    v2 = jax.random.normal(k2, (c2, c1, 1, 1), jnp.float32)
    v3 = jax.random.normal(k3, (c, c2, kernel_size, kernel_size), jnp.float32)

    def weight_norm(v, g):  # per-output-channel norm (torch weight_norm dim=0)
        nrm = jnp.sqrt(jnp.sum(v * v, axis=(1, 2, 3), keepdims=True))
        return (g / nrm) * v

    w1 = weight_norm(v1, 2.0)           # init.constant_(weight_g, 2.0)
    w2 = weight_norm(v2, 2.0)           # init.constant_(weight_g, 2.0)
    w3 = weight_norm(v3, res_scale)     # init.constant_(weight_g, res_scale)
    b1 = jnp.zeros((c1,), jnp.float32)  # init.zeros_(bias)
    b2 = jnp.zeros((c2,), jnp.float32)
    b3 = jnp.zeros((c,), jnp.float32)
    return (w1, b1, w2, b2, w3, b3)


# --------------------------------------------------------------------------
# Pure-JAX reference (for verification)
# --------------------------------------------------------------------------
def reference(x, params, kernel_size):
    w1, b1, w2, b2, w3, b3 = params
    dn = ("NCHW", "OIHW", "NCHW")
    t = lax.conv_general_dilated(x, w1, (1, 1), "VALID", dimension_numbers=dn)
    t = jnp.maximum(t + b1[None, :, None, None], 0.0)
    t = lax.conv_general_dilated(t, w2, (1, 1), "VALID", dimension_numbers=dn)
    t = t + b2[None, :, None, None]
    p = kernel_size // 2
    t = lax.conv_general_dilated(t, w3, (1, 1), ((p, p), (p, p)), dimension_numbers=dn)
    t = t + b3[None, :, None, None]
    return t + x


if __name__ == "__main__":
    key = jax.random.PRNGKey(0)
    kx, kp = jax.random.split(key)

    N, C, H, W = 2, 4, 16, 16          # num_residual_units = 4
    KS = 3                             # kernel_size = 3

    x = jax.random.normal(kx, (N, C, H, W), jnp.float32)
    params = init_params(kp, C, KS, res_scale=1.0)

    out = jax.block_until_ready(wdsr_b_block(x, params, kernel_size=KS))
    ref = reference(x, params, KS)

    assert out.shape == (N, C, H, W)
    err = float(jnp.max(jnp.abs(out - ref)))
    assert jnp.allclose(out, ref, atol=1e-3, rtol=1e-3), err
    print("KERNEL_OK")
</pallas_src>

<mosaic_0001>
module attributes {stable_mosaic.version = 11 : i64} {
  func.func @_wdsr_block_kernel(%arg0: i32, %arg1: i32, %arg2: memref<1x4x8x16xf32, #tpu.memory_space<vmem>>, %arg3: memref<1x4x128xf32, #tpu.memory_space<vmem>>, %arg4: memref<1x4x8x16xf32, #tpu.memory_space<vmem>>, %arg5: memref<24x4xf32, #tpu.memory_space<vmem>>, %arg6: memref<24x1xf32, #tpu.memory_space<vmem>>, %arg7: memref<3x24xf32, #tpu.memory_space<vmem>>, %arg8: memref<3x1xf32, #tpu.memory_space<vmem>>, %arg9: memref<3x3x4x3xf32, #tpu.memory_space<vmem>>, %arg10: memref<4x1xf32, #tpu.memory_space<vmem>>, %arg11: memref<1x4x128xf32, #tpu.memory_space<vmem>>, %arg12: memref<4x162xf32, #tpu.memory_space<vmem>>) attributes {dimension_semantics = [#tpu.dimension_semantics<parallel>, #tpu.dimension_semantics<parallel>], iteration_bounds = array<i64: 2, 2>, scalar_prefetch = 0 : i64, scratch_operands = 1 : i64, tpu.core_type = #tpu.core_type<tc>, window_params = [{transform_indices = @transform_0, window_bounds = array<i64: 1, 4, 8, 16>}, {transform_indices = @transform_1, window_bounds = array<i64: 1, 4, 128>}, {transform_indices = @transform_2, window_bounds = array<i64: 1, 4, 8, 16>}, {pipeline_mode = #tpu.pipeline_mode<synchronous>, transform_indices = @transform_3, window_bounds = array<i64: 24, 4>}, {pipeline_mode = #tpu.pipeline_mode<synchronous>, transform_indices = @transform_4, window_bounds = array<i64: 24, 1>}, {pipeline_mode = #tpu.pipeline_mode<synchronous>, transform_indices = @transform_5, window_bounds = array<i64: 3, 24>}, {pipeline_mode = #tpu.pipeline_mode<synchronous>, transform_indices = @transform_6, window_bounds = array<i64: 3, 1>}, {pipeline_mode = #tpu.pipeline_mode<synchronous>, transform_indices = @transform_7, window_bounds = array<i64: 3, 3, 4, 3>}, {pipeline_mode = #tpu.pipeline_mode<synchronous>, transform_indices = @transform_8, window_bounds = array<i64: 4, 1>}, {transform_indices = @transform_9, window_bounds = array<i64: 1, 4, 128>}]} {
    %c0 = arith.constant 0 : index
    %c0_0 = arith.constant 0 : index
    %c0_1 = arith.constant 0 : index
    %0 = vector.load %arg3[%c0, %c0_0, %c0_1] : memref<1x4x128xf32, #tpu.memory_space<vmem>>, vector<1x4x128xf32>
    %1 = vector.shape_cast %0 : vector<1x4x128xf32> to vector<4x128xf32>
    %cst = arith.constant 0.000000e+00 : f32
    %2 = vector.broadcast %cst : f32 to vector<4x1xf32>
    %c0_2 = arith.constant 0 : index
    %c0_3 = arith.constant 0 : index
    %3 = vector.load %arg12[%c0_2, %c0_3] : memref<4x162xf32, #tpu.memory_space<vmem>>, vector<4x1xf32>
    tpu.vector_store %arg12[%c0_2, %c0_3], %2 {strides = array<i32>} : memref<4x162xf32, #tpu.memory_space<vmem>>, vector<4x1xf32>,
    %cst_4 = arith.constant 0.000000e+00 : f32
    %4 = vector.broadcast %cst_4 : f32 to vector<4x1xf32>
    %c0_5 = arith.constant 0 : index
    %c161 = arith.constant 161 : index
    %5 = vector.load %arg12[%c0_5, %c161] : memref<4x162xf32, #tpu.memory_space<vmem>>, vector<4x1xf32>
    tpu.vector_store %arg12[%c0_5, %c161], %4 {strides = array<i32>} : memref<4x162xf32, #tpu.memory_space<vmem>>, vector<4x1xf32>,
    %c0_6 = arith.constant 0 : index
    %c0_7 = arith.constant 0 : index
    %c7 = arith.constant 7 : index
    %c0_8 = arith.constant 0 : index
    %6 = vector.load %arg2[%c0_6, %c0_7, %c7, %c0_8] : memref<1x4x8x16xf32, #tpu.memory_space<vmem>>, vector<1x4x1x16xf32>
    %7 = vector.shape_cast %6 : vector<1x4x1x16xf32> to vector<4x16xf32>
    %c0_9 = arith.constant 0 : index
    %c1 = arith.constant 1 : index
    %8 = vector.load %arg12[%c0_9, %c1] : memref<4x162xf32, #tpu.memory_space<vmem>>, vector<4x16xf32>
    tpu.vector_store %arg12[%c0_9, %c1], %7 {strides = array<i32>} : memref<4x162xf32, #tpu.memory_space<vmem>>, vector<4x16xf32>,
    %c0_10 = arith.constant 0 : index
    %c0_11 = arith.constant 0 : index
    %c0_12 = arith.constant 0 : index
    %c0_13 = arith.constant 0 : index
    %9 = vector.load %arg4[%c0_10, %c0_11, %c0_12, %c0_13] : memref<1x4x8x16xf32, #tpu.memory_space<vmem>>, vector<1x4x1x16xf32>
    %10 = vector.shape_cast %9 : vector<1x4x1x16xf32> to vector<4x16xf32>
    %c0_14 = arith.constant 0 : index
    %c145 = arith.constant 145 : index
    %11 = vector.load %arg12[%c0_14, %c145] : memref<4x162xf32, #tpu.memory_space<vmem>>, vector<4x16xf32>
    tpu.vector_store %arg12[%c0_14, %c145], %10 {strides = array<i32>} : memref<4x162xf32, #tpu.memory_space<vmem>>, vector<4x16xf32>,
    %c0_15 = arith.constant 0 : index
    %c17 = arith.constant 17 : index
    %12 = vector.load %arg12[%c0_15, %c17] : memref<4x162xf32, #tpu.memory_space<vmem>>, vector<4x128xf32>
    tpu.vector_store %arg12[%c0_15, %c17], %1 {strides = array<i32>} : memref<4x162xf32, #tpu.memory_space<vmem>>, vector<4x128xf32>,
    %c0_16 = arith.constant 0 : index
    %c0_17 = arith.constant 0 : index
    %13 = vector.load %arg12[%c0_16, %c0_17] : memref<4x162xf32, #tpu.memory_space<vmem>>, vector<4x162xf32>
    %c0_18 = arith.constant 0 : index
    %c0_19 = arith.constant 0 : index
    %14 = vector.load %arg5[%c0_18, %c0_19] : memref<24x4xf32, #tpu.memory_space<vmem>>, vector<24x4xf32>
    %cst_20 = arith.constant dense<0.000000e+00> : vector<24x162xf32>
    %15 = tpu.matmul %14, %13, %cst_20 {dimension_numbers = #tpu.dot_dimension_numbers<[1], [0], [0], [1], [0, 0, 1, 1], [], []>} : vector<24x4xf32>, vector<4x162xf32>, vector<24x162xf32> -> vector<24x162xf32>
    %c0_21 = arith.constant 0 : index
    %c0_22 = arith.constant 0 : index
    %16 = vector.load %arg6[%c0_21, %c0_22] : memref<24x1xf32, #tpu.memory_space<vmem>>, vector<24x1xf32>
    %17 = vector.broadcast %16 : vector<24x1xf32> to vector<24x162xf32>
    %18 = arith.addf %15, %17 : vector<24x162xf32>
    %cst_23 = arith.constant 0.000000e+00 : f32
    %19 = vector.broadcast %cst_23 : f32 to vector<24x162xf32>
    %20 = arith.maximumf %18, %19 : vector<24x162xf32>
    %c0_24 = arith.constant 0 : index
    %c0_25 = arith.constant 0 : index
    %21 = vector.load %arg7[%c0_24, %c0_25] : memref<3x24xf32, #tpu.memory_space<vmem>>, vector<3x24xf32>
    %cst_26 = arith.constant dense<0.000000e+00> : vector<3x162xf32>
    %22 = tpu.matmul %21, %20, %cst_26 {dimension_numbers = #tpu.dot_dimension_numbers<[1], [0], [0], [1], [0, 0, 1, 1], [], []>} : vector<3x24xf32>, vector<24x162xf32>, vector<3x162xf32> -> vector<3x162xf32>
    %c0_27 = arith.constant 0 : index
    %c0_28 = arith.constant 0 : index
    %23 = vector.load %arg8[%c0_27, %c0_28] : memref<3x1xf32, #tpu.memory_space<vmem>>, vector<3x1xf32>
    %24 = vector.broadcast %23 : vector<3x1xf32> to vector<3x162xf32>
    %25 = arith.addf %22, %24 : vector<3x162xf32>
    %26 = tpu.iota {dimensions = array<i32: 1>} : vector<1x162xi32>
    %c1_i32 = arith.constant 1 : i32
    %27 = vector.broadcast %c1_i32 : i32 to vector<1x162xi32>
    %28 = arith.cmpi sge, %26, %27 : vector<1x162xi32>
    %c17_i32 = arith.constant 17 : i32
    %29 = vector.broadcast %c17_i32 : i32 to vector<1x162xi32>
    %30 = arith.cmpi slt, %26, %29 : vector<1x162xi32>
    %31 = arith.andi %28, %30 : vector<1x162xi1>
    %c145_i32 = arith.constant 145 : i32
    %32 = vector.broadcast %c145_i32 : i32 to vector<1x162xi32>
    %33 = arith.cmpi sge, %26, %32 : vector<1x162xi32>
    %c161_i32 = arith.constant 161 : i32
    %34 = vector.broadcast %c161_i32 : i32 to vector<1x162xi32>
    %35 = arith.cmpi slt, %26, %34 : vector<1x162xi32>
    %36 = arith.andi %33, %35 : vector<1x162xi1>
    %c0_i32 = arith.constant 0 : i32
    %37 = arith.cmpi eq, %arg1, %c0_i32 : i32
    %38 = vector.broadcast %37 : i1 to vector<1x162xi1>
    %39 = arith.andi %38, %31 : vector<1x162xi1>
    %c1_i32_29 = arith.constant 1 : i32
    %40 = arith.cmpi eq, %arg1, %c1_i32_29 : i32
    %41 = vector.broadcast %40 : i1 to vector<1x162xi1>
    %42 = arith.andi %41, %36 : vector<1x162xi1>
    %43 = arith.ori %39, %42 : vector<1x162xi1>
    %cst_30 = arith.constant 0.000000e+00 : f32
    %44 = vector.shape_cast %43 : vector<1x162xi1> to vector<1x162xi1>
    %45 = vector.broadcast %44 : vector<1x162xi1> to vector<3x162xi1>
    %46 = vector.broadcast %cst_30 : f32 to vector<3x162xf32>
    %47 = arith.select %45, %46, %25 : vector<3x162xi1>, vector<3x162xf32>
    %48 = tpu.iota {dimensions = array<i32: 1>} : vector<1x128xi32>
    %c16_i32 = arith.constant 16 : i32
    %c0_i32_31 = arith.constant 0 : i32
    %49 = arith.cmpi eq, %c16_i32, %c0_i32_31 : i32
    %c1_i32_32 = arith.constant 1 : i32
    %50 = arith.select %49, %c1_i32_32, %c16_i32 : i32
    %51 = vector.broadcast %50 : i32 to vector<1x128xi32>
    %52 = arith.remsi %48, %51 : vector<1x128xi32>
    %c0_i32_33 = arith.constant 0 : i32
    %53 = vector.broadcast %c0_i32_33 : i32 to vector<1x128xi32>
    %54 = arith.cmpi ne, %52, %53 : vector<1x128xi32>
    %c0_i32_34 = arith.constant 0 : i32
    %55 = vector.broadcast %c0_i32_34 : i32 to vector<1x128xi32>
    %56 = arith.cmpi slt, %52, %55 : vector<1x128xi32>
    %c0_i32_35 = arith.constant 0 : i32
    %57 = arith.cmpi slt, %50, %c0_i32_35 : i32
    %58 = vector.broadcast %57 : i1 to vector<1x128xi1>
    %59 = vector.broadcast %58 : vector<1x128xi1> to vector<1x128xi1>
    %60 = arith.xori %56, %59 : vector<1x128xi1>
    %61 = arith.andi %60, %54 : vector<1x128xi1>
    %62 = vector.broadcast %50 : i32 to vector<1x128xi32>
    %63 = arith.addi %52, %62 : vector<1x128xi32>
    %64 = arith.select %61, %63, %52 : vector<1x128xi1>, vector<1x128xi32>
    %cst_36 = arith.constant 0.000000e+00 : f32
    %65 = vector.broadcast %cst_36 : f32 to vector<4x128xf32>
    %66 = vector.extract_strided_slice %47 {offsets = [0, 0], sizes = [3, 128], strides = [1, 1]} : vector<3x162xf32> to vector<3x128xf32>
    %c-1_i32 = arith.constant -1 : i32
    %67 = vector.broadcast %c-1_i32 : i32 to vector<1x128xi32>
    %68 = arith.addi %64, %67 : vector<1x128xi32>
    %c0_i32_37 = arith.constant 0 : i32
    %69 = vector.broadcast %c0_i32_37 : i32 to vector<1x128xi32>
    %70 = arith.cmpi sge, %68, %69 : vector<1x128xi32>
    %c-1_i32_38 = arith.constant -1 : i32
    %71 = vector.broadcast %c-1_i32_38 : i32 to vector<1x128xi32>
    %72 = arith.addi %64, %71 : vector<1x128xi32>
    %c16_i32_39 = arith.constant 16 : i32
    %73 = vector.broadcast %c16_i32_39 : i32 to vector<1x128xi32>
    %74 = arith.cmpi slt, %72, %73 : vector<1x128xi32>
    %75 = arith.andi %70, %74 : vector<1x128xi1>
    %cst_40 = arith.constant 0.000000e+00 : f32
    %76 = vector.shape_cast %75 : vector<1x128xi1> to vector<1x128xi1>
    %77 = vector.broadcast %76 : vector<1x128xi1> to vector<3x128xi1>
    %78 = vector.broadcast %cst_40 : f32 to vector<3x128xf32>
    %79 = arith.select %77, %66, %78 : vector<3x128xi1>, vector<3x128xf32>
    %c0_41 = arith.constant 0 : index
    %c0_42 = arith.constant 0 : index
    %c0_43 = arith.constant 0 : index
    %c0_44 = arith.constant 0 : index
    %80 = vector.load %arg9[%c0_41, %c0_42, %c0_43, %c0_44] : memref<3x3x4x3xf32, #tpu.memory_space<vmem>>, vector<1x1x4x3xf32>
    %81 = vector.shape_cast %80 : vector<1x1x4x3xf32> to vector<4x3xf32>
    %cst_45 = arith.constant dense<0.000000e+00> : vector<4x128xf32>
    %82 = tpu.matmul %81, %79, %cst_45 {dimension_numbers = #tpu.dot_dimension_numbers<[1], [0], [0], [1], [0, 0, 1, 1], [], []>} : vector<4x3xf32>, vector<3x128xf32>, vector<4x128xf32> -> vector<4x128xf32>
    %83 = arith.addf %65, %82 : vector<4x128xf32>
    %84 = vector.extract_strided_slice %47 {offsets = [0, 1], sizes = [3, 128], strides = [1, 1]} : vector<3x162xf32> to vector<3x128xf32>
    %c0_46 = arith.constant 0 : index
    %c1_47 = arith.constant 1 : index
    %c0_48 = arith.constant 0 : index
    %c0_49 = arith.constant 0 : index
    %85 = vector.load %arg9[%c0_46, %c1_47, %c0_48, %c0_49] : memref<3x3x4x3xf32, #tpu.memory_space<vmem>>, vector<1x1x4x3xf32>
    %86 = vector.shape_cast %85 : vector<1x1x4x3xf32> to vector<4x3xf32>
    %cst_50 = arith.constant dense<0.000000e+00> : vector<4x128xf32>
    %87 = tpu.matmul %86, %84, %cst_50 {dimension_numbers = #tpu.dot_dimension_numbers<[1], [0], [0], [1], [0, 0, 1, 1], [], []>} : vector<4x3xf32>, vector<3x128xf32>, vector<4x128xf32> -> vector<4x128xf32>
    %88 = arith.addf %83, %87 : vector<4x128xf32>
    %89 = vector.extract_strided_slice %47 {offsets = [0, 2], sizes = [3, 128], strides = [1, 1]} : vector<3x162xf32> to vector<3x128xf32>
    %c1_i32_51 = arith.constant 1 : i32
    %90 = vector.broadcast %c1_i32_51 : i32 to vector<1x128xi32>
    %91 = arith.addi %64, %90 : vector<1x128xi32>
    %c0_i32_52 = arith.constant 0 : i32
    %92 = vector.broadcast %c0_i32_52 : i32 to vector<1x128xi32>
    %93 = arith.cmpi sge, %91, %92 : vector<1x128xi32>
    %c1_i32_53 = arith.constant 1 : i32
    %94 = vector.broadcast %c1_i32_53 : i32 to vector<1x128xi32>
    %95 = arith.addi %64, %94 : vector<1x128xi32>
    %c16_i32_54 = arith.constant 16 : i32
    %96 = vector.broadcast %c16_i32_54 : i32 to vector<1x128xi32>
    %97 = arith.cmpi slt, %95, %96 : vector<1x128xi32>
    %98 = arith.andi %93, %97 : vector<1x128xi1>
    %cst_55 = arith.constant 0.000000e+00 : f32
    %99 = vector.shape_cast %98 : vector<1x128xi1> to vector<1x128xi1>
    %100 = vector.broadcast %99 : vector<1x128xi1> to vector<3x128xi1>
    %101 = vector.broadcast %cst_55 : f32 to vector<3x128xf32>
    %102 = arith.select %100, %89, %101 : vector<3x128xi1>, vector<3x128xf32>
    %c0_56 = arith.constant 0 : index
    %c2 = arith.constant 2 : index
    %c0_57 = arith.constant 0 : index
    %c0_58 = arith.constant 0 : index
    %103 = vector.load %arg9[%c0_56, %c2, %c0_57, %c0_58] : memref<3x3x4x3xf32, #tpu.memory_space<vmem>>, vector<1x1x4x3xf32>
    %104 = vector.shape_cast %103 : vector<1x1x4x3xf32> to vector<4x3xf32>
    %cst_59 = arith.constant dense<0.000000e+00> : vector<4x128xf32>
    %105 = tpu.matmul %104, %102, %cst_59 {dimension_numbers = #tpu.dot_dimension_numbers<[1], [0], [0], [1], [0, 0, 1, 1], [], []>} : vector<4x3xf32>, vector<3x128xf32>, vector<4x128xf32> -> vector<4x128xf32>
    %106 = arith.addf %88, %105 : vector<4x128xf32>
    %107 = vector.extract_strided_slice %47 {offsets = [0, 16], sizes = [3, 128], strides = [1, 1]} : vector<3x162xf32> to vector<3x128xf32>
    %c-1_i32_60 = arith.constant -1 : i32
    %108 = vector.broadcast %c-1_i32_60 : i32 to vector<1x128xi32>
    %109 = arith.addi %64, %108 : vector<1x128xi32>
    %c0_i32_61 = arith.constant 0 : i32
    %110 = vector.broadcast %c0_i32_61 : i32 to vector<1x128xi32>
    %111 = arith.cmpi sge, %109, %110 : vector<1x128xi32>
    %c-1_i32_62 = arith.constant -1 : i32
    %112 = vector.broadcast %c-1_i32_62 : i32 to vector<1x128xi32>
    %113 = arith.addi %64, %112 : vector<1x128xi32>
    %c16_i32_63 = arith.constant 16 : i32
    %114 = vector.broadcast %c16_i32_63 : i32 to vector<1x128xi32>
    %115 = arith.cmpi slt, %113, %114 : vector<1x128xi32>
    %116 = arith.andi %111, %115 : vector<1x128xi1>
    %cst_64 = arith.constant 0.000000e+00 : f32
    %117 = vector.shape_cast %116 : vector<1x128xi1> to vector<1x128xi1>
    %118 = vector.broadcast %117 : vector<1x128xi1> to vector<3x128xi1>
    %119 = vector.broadcast %cst_64 : f32 to vector<3x128xf32>
    %120 = arith.select %118, %107, %119 : vector<3x128xi1>, vector<3x128xf32>
    %c1_65 = arith.constant 1 : index
    %c0_66 = arith.constant 0 : index
    %c0_67 = arith.constant 0 : index
    %c0_68 = arith.constant 0 : index
    %121 = vector.load %arg9[%c1_65, %c0_66, %c0_67, %c0_68] : memref<3x3x4x3xf32, #tpu.memory_space<vmem>>, vector<1x1x4x3xf32>
    %122 = vector.shape_cast %121 : vector<1x1x4x3xf32> to vector<4x3xf32>
    %cst_69 = arith.constant dense<0.000000e+00> : vector<4x128xf32>
    %123 = tpu.matmul %122, %120, %cst_69 {dimension_numbers = #tpu.dot_dimension_numbers<[1], [0], [0], [1], [0, 0, 1, 1], [], []>} : vector<4x3xf32>, vector<3x128xf32>, vector<4x128xf32> -> vector<4x128xf32>
    %124 = arith.addf %106, %123 : vector<4x128xf32>
    %125 = vector.extract_strided_slice %47 {offsets = [0, 17], sizes = [3, 128], strides = [1, 1]} : vector<3x162xf32> to vector<3x128xf32>
    %c1_70 = arith.constant 1 : index
    %c1_71 = arith.constant 1 : index
    %c0_72 = arith.constant 0 : index
    %c0_73 = arith.constant 0 : index
    %126 = vector.load %arg9[%c1_70, %c1_71, %c0_72, %c0_73] : memref<3x3x4x3xf32, #tpu.memory_space<vmem>>, vector<1x1x4x3xf32>
    %127 = vector.shape_cast %126 : vector<1x1x4x3xf32> to vector<4x3xf32>
    %cst_74 = arith.constant dense<0.000000e+00> : vector<4x128xf32>
    %128 = tpu.matmul %127, %125, %cst_74 {dimension_numbers = #tpu.dot_dimension_numbers<[1], [0], [0], [1], [0, 0, 1, 1], [], []>} : vector<4x3xf32>, vector<3x128xf32>, vector<4x128xf32> -> vector<4x128xf32>
    %129 = arith.addf %124, %128 : vector<4x128xf32>
    %130 = vector.extract_strided_slice %47 {offsets = [0, 18], sizes = [3, 128], strides = [1, 1]} : vector<3x162xf32> to vector<3x128xf32>
    %c1_i32_75 = arith.constant 1 : i32
    %131 = vector.broadcast %c1_i32_75 : i32 to vector<1x128xi32>
    %132 = arith.addi %64, %131 : vector<1x128xi32>
    %c0_i32_76 = arith.constant 0 : i32
    %133 = vector.broadcast %c0_i32_76 : i32 to vector<1x128xi32>
    %134 = arith.cmpi sge, %132, %133 : vector<1x128xi32>
    %c1_i32_77 = arith.constant 1 : i32
    %135 = vector.broadcast %c1_i32_77 : i32 to vector<1x128xi32>
    %136 = arith.addi %64, %135 : vector<1x128xi32>
    %c16_i32_78 = arith.constant 16 : i32
    %137 = vector.broadcast %c16_i32_78 : i32 to vector<1x128xi32>
    %138 = arith.cmpi slt, %136, %137 : vector<1x128xi32>
    %139 = arith.andi %134, %138 : vector<1x128xi1>
    %cst_79 = arith.constant 0.000000e+00 : f32
    %140 = vector.shape_cast %139 : vector<1x128xi1> to vector<1x128xi1>
    %141 = vector.broadcast %140 : vector<1x128xi1> to vector<3x128xi1>
    %142 = vector.broadcast %cst_79 : f32 to vector<3x128xf32>
    %143 = arith.select %141, %130, %142 : vector<3x128xi1>, vector<3x128xf32>
    %c1_80 = arith.constant 1 : index
    %c2_81 = arith.constant 2 : index
    %c0_82 = arith.constant 0 : index
    %c0_83 = arith.constant 0 : index
    %144 = vector.load %arg9[%c1_80, %c2_81, %c0_82, %c0_83] : memref<3x3x4x3xf32, #tpu.memory_space<vmem>>, vector<1x1x4x3xf32>
    %145 = vector.shape_cast %144 : vector<1x1x4x3xf32> to vector<4x3xf32>
    %cst_84 = arith.constant dense<0.000000e+00> : vector<4x128xf32>
    %146 = tpu.matmul %145, %143, %cst_84 {dimension_numbers = #tpu.dot_dimension_numbers<[1], [0], [0], [1], [0, 0, 1, 1], [], []>} : vector<4x3xf32>, vector<3x128xf32>, vector<4x128xf32> -> vector<4x128xf32>
    %147 = arith.addf %129, %146 : vector<4x128xf32>
    %148 = vector.extract_strided_slice %47 {offsets = [0, 32], sizes = [3, 128], strides = [1, 1]} : vector<3x162xf32> to vector<3x128xf32>
    %c-1_i32_85 = arith.constant -1 : i32
    %149 = vector.broadcast %c-1_i32_85 : i32 to vector<1x128xi32>
    %150 = arith.addi %64, %149 : vector<1x128xi32>
    %c0_i32_86 = arith.constant 0 : i32
    %151 = vector.broadcast %c0_i32_86 : i32 to vector<1x128xi32>
    %152 = arith.cmpi sge, %150, %151 : vector<1x128xi32>
    %c-1_i32_87 = arith.constant -1 : i32
    %153 = vector.broadcast %c-1_i32_87 : i32 to vector<1x128xi32>
    %154 = arith.addi %64, %153 : vector<1x128xi32>
    %c16_i32_88 = arith.constant 16 : i32
    %155 = vector.broadcast %c16_i32_88 : i32 to vector<1x128xi32>
    %156 = arith.cmpi slt, %154, %155 : vector<1x128xi32>
    %157 = arith.andi %152, %156 : vector<1x128xi1>
    %cst_89 = arith.constant 0.000000e+00 : f32
    %158 = vector.shape_cast %157 : vector<1x128xi1> to vector<1x128xi1>
    %159 = vector.broadcast %158 : vector<1x128xi1> to vector<3x128xi1>
    %160 = vector.broadcast %cst_89 : f32 to vector<3x128xf32>
    %161 = arith.select %159, %148, %160 : vector<3x128xi1>, vector<3x128xf32>
    %c2_90 = arith.constant 2 : index
    %c0_91 = arith.constant 0 : index
    %c0_92 = arith.constant 0 : index
    %c0_93 = arith.constant 0 : index
    %162 = vector.load %arg9[%c2_90, %c0_91, %c0_92, %c0_93] : memref<3x3x4x3xf32, #tpu.memory_space<vmem>>, vector<1x1x4x3xf32>
    %163 = vector.shape_cast %162 : vector<1x1x4x3xf32> to vector<4x3xf32>
    %cst_94 = arith.constant dense<0.000000e+00> : vector<4x128xf32>
    %164 = tpu.matmul %163, %161, %cst_94 {dimension_numbers = #tpu.dot_dimension_numbers<[1], [0], [0], [1], [0, 0, 1, 1], [], []>} : vector<4x3xf32>, vector<3x128xf32>, vector<4x128xf32> -> vector<4x128xf32>
    %165 = arith.addf %147, %164 : vector<4x128xf32>
    %166 = vector.extract_strided_slice %47 {offsets = [0, 33], sizes = [3, 128], strides = [1, 1]} : vector<3x162xf32> to vector<3x128xf32>
    %c2_95 = arith.constant 2 : index
    %c1_96 = arith.constant 1 : index
    %c0_97 = arith.constant 0 : index
    %c0_98 = arith.constant 0 : index
    %167 = vector.load %arg9[%c2_95, %c1_96, %c0_97, %c0_98] : memref<3x3x4x3xf32, #tpu.memory_space<vmem>>, vector<1x1x4x3xf32>
    %168 = vector.shape_cast %167 : vector<1x1x4x3xf32> to vector<4x3xf32>
    %cst_99 = arith.constant dense<0.000000e+00> : vector<4x128xf32>
    %169 = tpu.matmul %168, %166, %cst_99 {dimension_numbers = #tpu.dot_dimension_numbers<[1], [0], [0], [1], [0, 0, 1, 1], [], []>} : vector<4x3xf32>, vector<3x128xf32>, vector<4x128xf32> -> vector<4x128xf32>
    %170 = arith.addf %165, %169 : vector<4x128xf32>
    %171 = vector.extract_strided_slice %47 {offsets = [0, 34], sizes = [3, 128], strides = [1, 1]} : vector<3x162xf32> to vector<3x128xf32>
    %c1_i32_100 = arith.constant 1 : i32
    %172 = vector.broadcast %c1_i32_100 : i32 to vector<1x128xi32>
    %173 = arith.addi %64, %172 : vector<1x128xi32>
    %c0_i32_101 = arith.constant 0 : i32
    %174 = vector.broadcast %c0_i32_101 : i32 to vector<1x128xi32>
    %175 = arith.cmpi sge, %173, %174 : vector<1x128xi32>
    %c1_i32_102 = arith.constant 1 : i32
    %176 = vector.broadcast %c1_i32_102 : i32 to vector<1x128xi32>
    %177 = arith.addi %64, %176 : vector<1x128xi32>
    %c16_i32_103 = arith.constant 16 : i32
    %178 = vector.broadcast %c16_i32_103 : i32 to vector<1x128xi32>
    %179 = arith.cmpi slt, %177, %178 : vector<1x128xi32>
    %180 = arith.andi %175, %179 : vector<1x128xi1>
    %cst_104 = arith.constant 0.000000e+00 : f32
    %181 = vector.shape_cast %180 : vector<1x128xi1> to vector<1x128xi1>
    %182 = vector.broadcast %181 : vector<1x128xi1> to vector<3x128xi1>
    %183 = vector.broadcast %cst_104 : f32 to vector<3x128xf32>
    %184 = arith.select %182, %171, %183 : vector<3x128xi1>, vector<3x128xf32>
    %c2_105 = arith.constant 2 : index
    %c2_106 = arith.constant 2 : index
    %c0_107 = arith.constant 0 : index
    %c0_108 = arith.constant 0 : index
    %185 = vector.load %arg9[%c2_105, %c2_106, %c0_107, %c0_108] : memref<3x3x4x3xf32, #tpu.memory_space<vmem>>, vector<1x1x4x3xf32>
    %186 = vector.shape_cast %185 : vector<1x1x4x3xf32> to vector<4x3xf32>
    %cst_109 = arith.constant dense<0.000000e+00> : vector<4x128xf32>
    %187 = tpu.matmul %186, %184, %cst_109 {dimension_numbers = #tpu.dot_dimension_numbers<[1], [0], [0], [1], [0, 0, 1, 1], [], []>} : vector<4x3xf32>, vector<3x128xf32>, vector<4x128xf32> -> vector<4x128xf32>
    %188 = arith.addf %170, %187 : vector<4x128xf32>
    %c0_110 = arith.constant 0 : index
    %c0_111 = arith.constant 0 : index
    %189 = vector.load %arg10[%c0_110, %c0_111] : memref<4x1xf32, #tpu.memory_space<vmem>>, vector<4x1xf32>
    %190 = vector.broadcast %189 : vector<4x1xf32> to vector<4x128xf32>
    %191 = arith.addf %188, %190 : vector<4x128xf32>
    %192 = arith.addf %191, %1 : vector<4x128xf32>
    %c0_112 = arith.constant 0 : index
    %c0_113 = arith.constant 0 : index
    %c0_114 = arith.constant 0 : index
    %193 = vector.load %arg11[%c0_112, %c0_113, %c0_114] : memref<1x4x128xf32, #tpu.memory_space<vmem>>, vector<1x4x128xf32>
    %194 = vector.shape_cast %193 : vector<1x4x128xf32> to vector<4x128xf32>
    %195 = vector.shape_cast %192 : vector<4x128xf32> to vector<1x4x128xf32>
    tpu.vector_store %arg11[%c0_112, %c0_113, %c0_114], %195 {strides = array<i32>} : memref<1x4x128xf32, #tpu.memory_space<vmem>>, vector<1x4x128xf32>,
    return
  }
  func.func @transform_0(%arg0: i32, %arg1: i32) -> (i32, i32, i32, i32) {
    %c1_i32 = arith.constant 1 : i32
    %0 = arith.muli %arg1, %c1_i32 : i32
    %c1_i32_0 = arith.constant 1 : i32
    %1 = arith.subi %0, %c1_i32_0 : i32
    %c0_i32 = arith.constant 0 : i32
    %2 = arith.maxsi %1, %c0_i32 : i32
    %c0_i32_1 = arith.constant 0 : i32
    %c0_i32_2 = arith.constant 0 : i32
    %c0_i32_3 = arith.constant 0 : i32
    return %arg0, %c0_i32_1, %2, %c0_i32_2 : i32, i32, i32, i32
  }
  func.func @transform_1(%arg0: i32, %arg1: i32) -> (i32, i32, i32) {
    %c0_i32 = arith.constant 0 : i32
    %c0_i32_0 = arith.constant 0 : i32
    return %arg0, %c0_i32, %arg1 : i32, i32, i32
  }
  func.func @transform_2(%arg0: i32, %arg1: i32) -> (i32, i32, i32, i32) {
    %c1_i32 = arith.constant 1 : i32
    %0 = arith.addi %arg1, %c1_i32 : i32
    %c1_i32_0 = arith.constant 1 : i32
    %1 = arith.muli %0, %c1_i32_0 : i32
    %c1_i32_1 = arith.constant 1 : i32
    %2 = arith.minsi %1, %c1_i32_1 : i32
    %c0_i32 = arith.constant 0 : i32
    %c0_i32_2 = arith.constant 0 : i32
    %c0_i32_3 = arith.constant 0 : i32
    return %arg0, %c0_i32, %2, %c0_i32_2 : i32, i32, i32, i32
  }
  func.func @transform_3(%arg0: i32, %arg1: i32) -> (i32, i32) {
    %c0_i32 = arith.constant 0 : i32
    %c0_i32_0 = arith.constant 0 : i32
    %c0_i32_1 = arith.constant 0 : i32
    return %c0_i32, %c0_i32_0 : i32, i32
  }
  func.func @transform_4(%arg0: i32, %arg1: i32) -> (i32, i32) {
    %c0_i32 = arith.constant 0 : i32
    %c0_i32_0 = arith.constant 0 : i32
    %c0_i32_1 = arith.constant 0 : i32
    return %c0_i32, %c0_i32_0 : i32, i32
  }
  func.func @transform_5(%arg0: i32, %arg1: i32) -> (i32, i32) {
    %c0_i32 = arith.constant 0 : i32
    %c0_i32_0 = arith.constant 0 : i32
    %c0_i32_1 = arith.constant 0 : i32
    return %c0_i32, %c0_i32_0 : i32, i32
  }
  func.func @transform_6(%arg0: i32, %arg1: i32) -> (i32, i32) {
    %c0_i32 = arith.constant 0 : i32
    %c0_i32_0 = arith.constant 0 : i32
    %c0_i32_1 = arith.constant 0 : i32
    return %c0_i32, %c0_i32_0 : i32, i32
  }
  func.func @transform_7(%arg0: i32, %arg1: i32) -> (i32, i32, i32, i32) {
    %c0_i32 = arith.constant 0 : i32
    %c0_i32_0 = arith.constant 0 : i32
    %c0_i32_1 = arith.constant 0 : i32
    %c0_i32_2 = arith.constant 0 : i32
    %c0_i32_3 = arith.constant 0 : i32
    return %c0_i32, %c0_i32_0, %c0_i32_1, %c0_i32_2 : i32, i32, i32, i32
  }
  func.func @transform_8(%arg0: i32, %arg1: i32) -> (i32, i32) {
    %c0_i32 = arith.constant 0 : i32
    %c0_i32_0 = arith.constant 0 : i32
    %c0_i32_1 = arith.constant 0 : i32
    return %c0_i32, %c0_i32_0 : i32, i32
  }
  func.func @transform_9(%arg0: i32, %arg1: i32) -> (i32, i32, i32) {
    %c0_i32 = arith.constant 0 : i32
    %c0_i32_0 = arith.constant 0 : i32
    return %arg0, %c0_i32, %arg1 : i32, i32, i32
  }
}

</mosaic_0001>

<bundles_post_ra>
// kernel: tpu_custom_call.1
= control target key start
LH: loop header
LB: loop body
LE: loop exit
PB: predicated region body
PF: predicated region fallthrough
CT: control target
= control target key end

     0   :  { %s2093_s0 = inlined_call_operand.hbm [shape: f32[2,4,16,16], index: 0, kind: input, shape index: {}]   ;;  %s2094_s1 = inlined_call_operand.vmem [shape: f32[2,4,256], index: 1, kind: input, shape index: {}]   ;;  %s2095_s2 = inlined_call_operand.hbm [shape: f32[2,4,16,16], index: 2, kind: input, shape index: {}]   ;;  %s2096_s3 = inlined_call_operand.vmem [shape: f32[24,4], index: 3, kind: input, shape index: {}]   ;;  %s2097_s4 = inlined_call_operand.vmem [shape: f32[24,1], index: 4, kind: input, shape index: {}]   ;;  %s2098_s5 = inlined_call_operand.vmem [shape: f32[3,24], index: 5, kind: input, shape index: {}]   ;;  %s2099_s6 = inlined_call_operand.vmem [shape: f32[3,1], index: 6, kind: input, shape index: {}]   ;;  %s2100_s7 = inlined_call_operand.vmem [shape: f32[3,3,4,3], index: 7, kind: input, shape index: {}]   ;;  %s2101_s8 = inlined_call_operand.vmem [shape: f32[4,1], index: 8, kind: input, shape index: {}]   ;;  %s2102_s9 = inlined_call_operand.hbm [shape: f32[2,4,256], index: 9, kind: output, shape index: {}]  }
   0x1   :  { %2118 = sst [smem:[#allocation23_spill]] %s2093_s0 }
   0x2   :  { %2119 = sst [smem:[#allocation24_spill]] %s2098_s5 }
   0x3   :  { %2120 = sst [smem:[#allocation25_spill]] %s2099_s6 }
   0x4   :  { %2121 = sst [smem:[#allocation26_spill]] %s2100_s7 }
   0x5   :  { %2122 = sst [smem:[#allocation27_spill]] %s2101_s8 }
   0x6   :  { %2123 = sst [smem:[#allocation28_spill]] %s2102_s9 }
   0x7   :  { %14 = vsyncpa [#allocation4], 0 }
   0x8   :  { %16 = vsyncpa [#allocation4 + $0x1], 0 }
   0x9   :  { %17 = vsyncpa [#allocation7], 0 }
   0xa   :  { %19 = vsyncpa [#allocation7 + $0x1], 0 }
   0xb   :  { %20 = vsyncpa [#allocation5], 0 }
   0xc   :  { %22 = vsyncpa [#allocation5 + $0x1], 0  ;;  %s1708_s30 = smov 0   ;;  %s1710_s10 = smov 0  }
   0xd   :  { %s1712_s11 = smov 0   ;;  %s1714_s12 = smov 0  }
   0xe   :  { %s1716_s13 = smov 0   ;;  %s1718_s14 = smov 0  }
   0xf   :  { %s1720_s15 = smov 0   ;;  %s1722_s16 = smov 0  }
  0x10   :  { %s1724_s17 = smov 0   ;;  %s1726_s18 = smov 0  }
  0x11   :  { %s1728_s19 = smov 0   ;;  %s1730_s20 = smov 0  }
  0x12   :  { %s1732_s21 = smov 0   ;;  %s1734_s22 = smov 0  }
  0x13 LB: > { %2124 = sst [smem:[#allocation12_spill]] %s1589_s30  ;;  %s1218_s23 = sadd.s32 4294967295, %s1641_s22   ;;  %s1641_s22 = sphi %s1734_s22, %s28_s22   ;;  %s1637_s21 = sphi %s1732_s21, %s2173_s21   ;;  %s1633_s20 = sphi %s1730_s20, %s2172_s20   ;;  %s1629_s19 = sphi %s1728_s19, %s2171_s19   ;;  %s1625_s18 = sphi %s1726_s18, %s2163_s18   ;;  %s1621_s17 = sphi %s1724_s17, %s2162_s17   ;;  %s1617_s16 = sphi %s1722_s16, %s2170_s16   ;;  %s1613_s15 = sphi %s1720_s15, %s2169_s15   ;;  %s1609_s14 = sphi %s1718_s14, %s2168_s14   ;;  %s1605_s13 = sphi %s1716_s13, %s2167_s13   ;;  %s1601_s12 = sphi %s1714_s12, %s2166_s12   ;;  %s1597_s11 = sphi %s1712_s11, %s2160_s11   ;;  %s1593_s10 = sphi %s1710_s10, %s2159_s10   ;;  %s1589_s30 = sphi %s1708_s30, %s2158_s30  }
  0x14   : > { %2125 = sst [smem:[#allocation13_spill]] %s1593_s10  ;;  %s1219_s24 = sadd.s32 4294967294, %s1641_s22  }
  0x15   : > { %2126 = sst [smem:[#allocation14_spill]] %s1597_s11  ;;  %s37_s25 = sadd.s32 1, %s1633_s20 }
  0x16   : > { %2127 = sst [smem:[#allocation15_spill]] %s1621_s17  ;;  %s40_s26 = sadd.s32 1, %s1637_s21 }
  0x17   : > { %2128 = sst [smem:[#allocation16_spill]] %s1633_s20  ;;  %p38_p0 = scmp.ge.s32.totalorder %s37_s25, 2 }
  0x18   : > { %s55_s27 = sadd.s32 1, %s1621_s17  ;;  %p62_p2 = scmp.ne.s32.totalorder %s1621_s17, %s1617_s16 }
  0x19   : > { %s2175_s25 = smov (%p38_p0, %s37_s25), 0  ;;  %s2177_s26 = smov (!%p38_p0, %s40_s26), %s1637_s21 }
  0x1a   : > { %2129 = sst [smem:[#allocation17_spill]] %s2175_s25  ;;  %p42_p1 = scmp.ge.s32.totalorder %s2177_s26, 2 }
  0x1b   : > { %p63_p3 = scmp.eq.s32.totalorder %s1641_s22, 0  ;;  %p68_p4 = scmp.ne.s32.totalorder %s1617_s16, %s1613_s15 }
  0x1c   : > { %s2179_s26 = smov (%p42_p1, %s2177_s26), 0  ;;  %p1801_p7 = scmp.eq.s32.totalorder %s1218_s23, 0 }
  0x1d   : > { %2130 = sst [smem:[#allocation18_spill]] %s2179_s26  ;;  %s1790_s28 = ssub.s32 %s1637_s21, %s2179_s26 }
  0x1e   : > { %p1796_p5 = por %p63_p3, %p62_p2  ;;  %p2114_p6 = scmp.eq.s32.totalorder %s1790_s28, 0 }
  0x1f   : > { %s267_s26 = ssub.s32 %s1633_s20, %s2175_s25  ;;  %s271_s7 = sadd.s32 1, %s1597_s11 }
  0x20   : > { %s1811_s8 = scalar_select %p2114_p6, %s1621_s17, %s55_s27  }
  0x21   : > { %p1815_p8 = por %p1801_p7, %p68_p4  ;;  %s268_s5 = sor.u32 %s267_s26, %s1790_s28 }
  0x22   : > { %2133 = sst [smem:[#allocation19_spill]] %s1811_s8  ;;  %p269_p9 = scmp.eq.s32.totalorder %s268_s5, 0 }
  0x23   : > { %p281_p10 = scmp.ne.s32.totalorder %s1597_s11, %s1593_s10  ;;  %p282_p11 = scmp.eq.s32.totalorder %s1218_s23, 3 }
  0x24   : > { %p287_p12 = scmp.ne.s32.totalorder %s1593_s10, %s1589_s30  ;;  %p288_p0 = scmp.eq.s32.totalorder %s1219_s24, 3 }
  0x25   : > { %s1825_s6 = scalar_select %p269_p9, %s1597_s11, %s271_s7  }
  0x26   : > { %p1827_p13 = por %p282_p11, %p281_p10  ;;  %p2113_p1 = scmp.lt.s32.totalorder %s1641_s22, 4 }
  0x27   : > { %2135 = sst [smem:[#allocation20_spill]] %s1825_s6  ;;  %p1832_p2 = por %p288_p0, %p287_p12 }
  0x28   : > { %s2136_s25 = scalar_select %p1827_p13, 1, 0 }
  0x29   : > { %s2138_s27 = scalar_select %p1832_p2, 1, 0 }
  0x2a   : > { %2137 = sst [smem:[#allocation21_spill]] %s2136_s25  ;;  %s326_s26 = sand.u32 1, %s1621_s17  }
  0x2b   : > { %2139 = sst [smem:[#allocation22_spill]] %s2138_s27  ;;  %s1224_s20 = sshll.u32 %s326_s26, 5 }
  0x2c   : > { %s330_s5 = scalar_lea.vmem [#allocation3], %s1224_s20  ;;  %s2111_s23 = sshll.u32 %s1637_s21, 6 }
  0x2d   : > { %s1837_s8 = sshll.u32 %s330_s5, 4  ;;  %s2140_s0 = sld [smem:[#allocation23_spill]]  ;;  %s343_s8 = int_to_ptr.vmem [resolvable:$true] %s1837_s8 }
  0x2e   : > { %p1850_p4 = pnand %p2113_p1, %p1796_p5  ;;  %s327_s20 = scalar_lea.sflag [#allocation4], %s326_s26 }
  0x30   : > { %p1431_p10 = pneg %p1850_p4 }
  0x33   : > { %s339_s11 = scalar_lea.hbm %s2140_s0, %s2111_s23  ;;  %s1434_s29 = scalar_lea.hbm %s2140_s0, 128 }
  0x34   : > { %s340_s17 = sshll.u32 %s339_s11, 4  ;;  %s341_s17 = int_to_ptr.hbm [resolvable:$true] %s340_s17 }
  0x35   : > { %s1427_s5 = sshra.s32 %s341_s17, 4  ;;  %s1428_s5 = int_to_ptr.hbm [resolvable:$true] %s1427_s5 }
  0x36   : > { %s1429_s27 = scalar_lea.hbm %s1428_s5, 32  ;;  %p1435_p5 = scmp.lt.s32.totalorder %s1428_s5, %s2140_s0 }
  0x37   : > { %p1430_p9 = scmp.ne.s32.totalorder %s1428_s5, %s1429_s27  ;;  %p1436_p0 = scmp.lt.s32.totalorder %s1434_s29, %s1429_s27 }
  0x39   : > { %p1432_p11 = pnand %p1431_p10, %p1430_p9  ;;  %p1437_p1 = por %p1436_p0, %p1435_p5 }
  0x3b   : > { %p1433_p12 = pneg %p1432_p11 }
  0x3d   : > { %p1438_p6 = pnand %p1437_p1, %p1433_p12 }
  0x3f   : > { %1441 = shalt.err (!%p1438_p6)
}
  0x40   : > { %s1643_s11 = smov 256   ;;  %s1644_s30 = smov 128  }
  0x41   : > { %s1645_s27 = smov 8   ;;  %p1231_p6 = scmp.ge.s32.totalorder %s1641_s22, 1 }
  0x42   : > { %1287 = dma.hbm_to_vmem [thread:$0]  (!%p1850_p4), %s341_s17, 512, %s343_s8, %s327_s20, %s1643_s11, %s1644_s30, %s1645_s27  }
  0x43   : > { %p387_p1 = scmp.lt.s32.totalorder %s1641_s22, 5  ;;  %s117_s23 = sadd.s32 1, %s1609_s14 }
  0x44   : > { %p124_p10 = scmp.ne.s32.totalorder %s1609_s14, %s1605_s13  ;;  %p130_p11 = scmp.ne.s32.totalorder %s1605_s13, %s1601_s12 }
  0x45   : > { %p1866_p9 = pnand %p1231_p6, %p387_p1  ;;  %s363_s5 = sand.u32 1, %s1609_s14  }
  0x46   : > { %p126_p12 = por %p124_p10, %p63_p3  ;;  %p1880_p5 = por %p130_p11, %p1801_p7 }
  0x47   : > { %s1228_s24 = sshll.u32 %s363_s5, 5  ;;  %p2144_p4 = scmp.eq.s32.totalorder %s1790_s28, 0 }
  0x48   : > { %s367_s8 = scalar_lea.vmem [#allocation6], %s1228_s24  ;;  %s2145_s7 = sshll.u32 %s1637_s21, 6 }
  0x49   : > { %s379_s17 = sshll.u32 %s367_s8, 4  ;;  %s1585_s29 = sadd.s32 8, %s2145_s7  ;;  %s380_s17 = int_to_ptr.vmem [resolvable:$true] %s379_s17 }
  0x4a   : > { %s1887_s20 = scalar_select %p2144_p4, %s1609_s14, %s117_s23  }
  0x4b   : > { %s376_s12 = scalar_lea.hbm %s2095_s2, %s1585_s29  ;;  %p2146_p0 = scmp.lt.s32.totalorder %s1641_s22, 4 }
  0x4c   : > { %s377_s9 = sshll.u32 %s376_s12, 4  ;;  %s364_s10 = scalar_lea.sflag [#allocation7], %s363_s5  ;;  %s378_s9 = int_to_ptr.hbm [resolvable:$true] %s377_s9 }
  0x4d   : > { %p1288_p3 = pnand %p2146_p0, %p126_p12  ;;  %391 = sbr.rel (%p1866_p9) target bundleno = 817 (0x331), region = 56 }
  0x4e   : > { %s393_s28 = sand.u32 (!%p1866_p9), 1, %s1617_s16  }
  0x4f   : > { %1290 = dma.hbm_to_vmem [thread:$0]  (!%p1288_p3), %s378_s9, 512, %s380_s17, %s364_s10, %s1643_s11, %s1644_s30, %s1645_s27  }
  0x50   : > { %s1232_s23 = sshll.u32 (!%p1866_p9), %s393_s28, 5  ;;  %s394_s24 = scalar_lea.sflag (!%p1866_p9), [#allocation4], %s393_s28 }
  0x51   : > { %s1899_s8 = scalar_lea.vmem (!%p1866_p9), [#allocation3], %s1232_s23 }
  0x52   : > { %1572 = dma.done.wait (%p1815_p8), %s394_s24, 512  }
  0x53   : > { %1574 = vsyncadd (%p1815_p8), %s394_s24, 4294966784  ;;  %s403_s0 = sand.u32 1, %s1605_s13  }
  0x54   : > { %s1233_s25 = sshll.u32 %s403_s0, 5  ;;  %s404_s10 = scalar_lea.sflag [#allocation7], %s403_s0 }
  0x55   : > { %s407_s11 = scalar_lea.vmem [#allocation6], %s1233_s25 }
  0x56   : > { %1576 = dma.done.wait (%p1880_p5), %s404_s10, 512  }
  0x57   : > { %1578 = vsyncadd (%p1880_p5), %s404_s10, 4294966784  ;;  %p459_p7 = scmp.lt.s32.totalorder %s1629_s19, 1  ;;  %p461_p6 = scmp.lt.s32.totalorder %s1625_s18, 1  ;;  %vm484_vm0 = vcmask 1041409   ;;  %vm486_vm1 = vcmask 1045509   ;;  %vm489_vm2 = vcmask 1042434  }
  0x58   : > { %v503_v0 = vld [vmem:[%s407_s11] sm:$0x1]  ;;  %v504_v1 = vld [vmem:[%s407_s11 + $0x8] sm:$0x1]  ;;  %v505_v2 = vld [vmem:[%s407_s11 + $0x10] sm:$0x1] }
  0x59   : > { %s460_s30 = scalar_select %p459_p7, %s1629_s19, 1  ;;  %v506_v4 = vld [vmem:[%s407_s11 + $0x18] sm:$0x1]  ;;  %v511_v5 = vrot.slane %v504_v1, 7  ;;  %v514_v6 = vrot.slane %v505_v2, 6  ;;  %vm491_vm3 = vcmask 1046534   ;;  %v686_v2 = vlaneseq }
  0x5a   : > { %s462_s15 = scalar_select %p461_p6, %s1625_s18, 1  ;;  %v475_v7 = vld [vmem:[%s1899_s8 + $0x7] sm:$0x1]  ;;  %v476_v8 = vld [vmem:[%s1899_s8 + $0xf] sm:$0x1]  ;;  %v517_v10 = vrot.slane %v506_v4, 5 }
  0x5b   : > { %s1235_s27 = sshll.u32 %s460_s30, 1  ;;  %s1646_s29 = smov 17   ;;  %v512_v9 = vsel %vm484_vm0, %v511_v5, %v503_v0  ;;  %v477_v11 = vld [vmem:[%s1899_s8 + $0x17] sm:$0x1]  ;;  %v478_v12 = vld [vmem:[%s1899_s8 + $0x1f] sm:$0x1] }
  0x5c   : > { %s464_s26 = sadd.s32 %s1235_s27, %s462_s15  ;;  %v483_v13 = vrot.slane %v476_v8, 7  ;;  %vm494_vm4 = vcmask 1043459   ;;  %v513_v14 = vsel %vm486_vm1, %v511_v5, %v512_v9  ;;  %v488_v15 = vrot.slane %v477_v11, 6  ;;  %s1647_s12 = smov 1   ;;  %v541_v33 = vld [vmem:[%s2097_s4 + $0x8] sm:$0xff]  ;;  %v542_v34 = vld [vmem:[%s2097_s4 + $0x10] sm:$0xff] }
  0x5d   : > { %s1236_s5 = sshll.u32 %s464_s26, 2  ;;  %vm496_vm5 = vcmask 1047559   ;;  %v515_v16 = vsel %vm489_vm2, %v514_v6, %v513_v14  ;;  %v493_v18 = vrot.slane %v478_v12, 5  ;;  %vm473_vm6 = vcmask 273672   ;;  %v540_v37 = vld [vmem:[%s2097_s4] sm:$0xff]  ;;  %v538_v41 = vld [vmem:[%s2096_s3 + $0x8] sm:$0xff] }
  0x5e   : > { %s466_s6 = scalar_lea.vmem %s2094_s1, %s1236_s5  ;;  %v485_v17 = vsel %vm484_vm0, %v483_v13, %v475_v7  ;;  %v516_v19 = vsel %vm491_vm3, %v514_v6, %v515_v16  ;;  %v1648_v27 = vmov 0.0   ;;  %vm471_vm7 = vcmask 3072   ;;  %v537_v38 = vld [vmem:[%s2096_s3] sm:$0xff]  ;;  %v539_v42 = vld [vmem:[%s2096_s3 + $0x10] sm:$0xff]  ;;  %s2147_s17 = sld [smem:[#allocation25_spill]] }
  0x5f   : > { %v1917_v3 = vld [vmem:[%s466_s6] sm:$0xf]  ;;  %v487_v20 = vsel %vm486_vm1, %v483_v13, %v485_v17  ;;  %v518_v21 = vsel %vm494_vm4, %v517_v10, %v516_v19  ;;  %474 = vst.msk [vmem:[#allocation2 + $0x4] sm:$0xf] %vm473_vm6, %v1648_v27  ;;  %vm523_vm8 = vcmask 265352   ;;  %vm532_vm9 = vcmask 1043592  }
  0x60   : > { %526 = vrot.lane.b32.xlu0 %v1917_v3, %s1646_s29  ;;  %v490_v22 = vsel %vm489_vm2, %v488_v15, %v487_v20  ;;  %v519_v23 = vsel %vm496_vm5, %v517_v10, %v518_v21  ;;  %472 = vst.msk [vmem:[#allocation2] sm:$0xf] %vm471_vm7, %v1648_v27  ;;  %vm533_vm10 = vcmask 138244   ;;  %vm529_vm11 = vcmask 138240   ;;  %p701_p8 = scmp.eq.s32.totalorder %s1625_s18, 0  ;;  %p707_p1 = scmp.eq.s32.totalorder %s1625_s18, 1 }
  0x61   : > { %v492_v24 = vsel %vm491_vm3, %v488_v15, %v490_v22  ;;  %520 = vrot.lane.b32.xlu1 %v519_v23, %s1646_s29  ;;  %vm501_vm12 = vcmask 134152   ;;  %vm534_vm13 = vmor %vm533_vm10, %vm532_vm9  ;;  %v1649_v35 = vmov 0   ;;  %vm572_vm14 = vcmask 1043456   ;;  %s2148_s29 = sld [smem:[#allocation24_spill]]  ;;  %s1650_s28 = smov 127  }
  0x62   : > { %v495_v25 = vsel %vm494_vm4, %v493_v18, %v492_v24  ;;  %1425 = vset.pattern.permute.xlu2 %v1649_v35  ;;  %1424 = vset.pattern.permute.xlu1 %v1649_v35  ;;  %vm562_vm15 = vcmask 31744   ;;  %vm642_vm0 = vcmask 195584   ;;  %v1957_v4 = vand.u32 127, %v686_v2  ;;  %s708_s9 = scalar_select %p707_p1, 1, 0 }
  0x63   : > { %v497_v26 = vsel %vm496_vm5, %v493_v18, %v495_v25  ;;  %550 = vperm.xlu2 %1425, %v541_v33   ;;  %1426 = vset.pattern.permute.xlu0 %v1649_v35  ;;  %s1651_s23 = smov 112   ;;  %s1652_s24 = smov 126  }
  0x64   : > { %v636_v43 = vld [vmem:[%s2147_s17] sm:$0x7]  ;;  %v688_v5 = vadd.s32 128, %v1957_v4  ;;  %vm689_vm1 = vcmp.ge.s32.totalorder %v1957_v4, 1  ;;  %vm691_vm2 = vcmp.lt.s32.totalorder %v1957_v4, 17  ;;  %v725_v7 = vand.u32 15, %v1957_v4 }
  0x65   : > { %v709_v8 = vstv %s708_s9  ;;  %vm693_vm5 = vmand %vm689_vm1, %vm691_vm2  ;;  %s1653_s8 = smov 96   ;;  %s1654_s0 = smov 95   ;;  %vm851_vm2 = vcmask 916480  }
  0x66   : > { %vm696_vm3 = vcmp.ge.s32.totalorder %v688_v5, 145  ;;  %vm698_vm4 = vcmp.lt.s32.totalorder %v688_v5, 161  ;;  %v1964_v9 = vadd.s32 4294967295, %v725_v7  ;;  %s1655_s25 = smov 111   ;;  %s1656_s10 = smov 110   ;;  %v804_v27 = vadd.s32 1, %v725_v7 }
  0x67   : > { %v635_v1 = vld [vmem:[%s2148_s29] sm:$0x7]  ;;  %vm700_vm7 = vmand %vm696_vm3, %vm698_vm4  ;;  %s2149_s15 = sld [smem:[#allocation27_spill]]  ;;  %s1657_s27 = smov 94   ;;  %vm922_vm3 = vcmask 900096   ;;  %vm890_vm4 = vcmask 908288  }
  0x68   : > { %498 = vrot.lane.b32.xlu0 %v497_v26, %s1647_s12  ;;  %s702_s12 = scalar_select %p701_p8, 1, 0  ;;  %vm806_vm1 = vcmp.lt.s32.totalorder %v804_v27, 16 }
  0x69   : > { %555 = vperm.xlu1 %1424, %v542_v34   ;;  %s2150_s17 = sld [smem:[#allocation26_spill]] }
  0x6a   : > { %v703_v6 = vstv %s702_s12  ;;  %s2152_s5 = sld [smem:[#allocation13_spill]] }
  0x6b   : > { %545 = vperm.xlu2 %1425, %v540_v37   ;;  %vm704_vm6 = vcmp.eq.s32.totalorder %v703_v6, 1 }
  0x6c   : > { %vm705_vm9 = vmand %vm704_vm6, %vm693_vm5  ;;  %vm998_vm5 = vcmask 777216   ;;  %vm1030_vm6 = vcmask 769024  }
  0x6d   : > { %v1063_v18 = vld [vmem:[%s2149_s15] sm:$0xf] }
  0x6f   : > { %s2151_s7 = smov %s2150_s17  ;;  %v740_v19 = vld [vmem:[%s2150_s17] sm:$0xf]  ;;  %s1274_s17 = sshll.u32 %s1629_s19, 1 }
  0x70   : > { %639 = vperm.xlu0 %1426, %v636_v43   ;;  %v1247_v24 = vld [vmem:[%s2151_s7 + $0x4] sm:$0xf]  ;;  %v1252_v34 = vld [vmem:[%s2151_s7 + $0x8] sm:$0xf]  ;;  %s453_s6 = sand.u32 1, %s2152_s5   ;;  %s1083_s29 = sadd.s32 %s1625_s18, %s1274_s17 }
  0x71   : > { %s1234_s12 = sshll.u32 %s453_s6, 2  ;;  %s1275_s9 = sshll.u32 %s1083_s29, 2 }
  0x72   : > { %s1073_s18 = scalar_lea.sflag [#allocation5], %s453_s6 }
  0xbd   : > { %v551_v46 = vpop.permute.xlu2 %550 }
  0xc5   : > { %v546_v50 = vpop.permute.xlu2 %545 }
  0xd2   : > { %v527_v28 = vpop.permute.xlu0 %526 }
  0xd3   : > { %v528_v29 = vrot.slane %v527_v28, 4  ;;  %v521_v30 = vpop.permute.xlu1 %520 }
  0xd4   : > { %524 = vst.msk [vmem:[#allocation2 + $0x4] sm:$0xf] %vm523_vm8, %v521_v30  ;;  %vm710_vm8 = vcmp.eq.s32.totalorder %v709_v8, 1 }
  0xd5   : > { %v530_v32 = vsel %vm529_vm11, %v528_v29, %v527_v28  ;;  %vm712_vm10 = vmand %vm710_vm8, %vm700_vm7  ;;  %vm734_vm11 = vcmp.ge.s32.totalorder %v1964_v9, 0 }
  0xda   : > { %v499_v31 = vpop.permute.xlu0 %498 }
  0xdb   : > { %502 = vst.msk [vmem:[#allocation2] sm:$0xf] %vm501_vm12, %v499_v31  ;;  %v556_v49 = vpop.permute.xlu1 %555  ;;  %vm755_vm12 = vcmask 1042432  }
  0xdc   : > { %535 = vst.msk [vmem:[#allocation2] sm:$0xff] %vm534_vm13, %v530_v32  ;;  %vm751_vm13 = vcmask 23552  }
  0xe2   : > { %v640_v10 = vpop.permute.xlu0 %639 }
  0xe3   : > { %v536_v36 = vld [vmem:[#allocation2] sm:$0xff] }
  0xe4   : > { %559 = vst [vmem:[#allocation1] ss:$2 sm:$0xff] %v536_v36 }
  0xeb   : > { %v560_v39 = vld.sshfl [vmem:[#allocation1] sm:$0xff pattern:$0x75316420]  ;;  %v561_v40 = vld.sshfl [vmem:[#allocation1 + $0x8] sm:$0xff pattern:$0x75316420] }
  0xec   : > { %1237 = vmatpush.msk.msra.mxu0 %vm572_vm14, %v560_v39  ;;  %1241 = vmatpush.msk.msra.mxu1 %vm572_vm14, %v561_v40  ;;  %vm749_vm14 = vcmask 1039360   ;;  %v1255_v39 = vld [vmem:[%s2151_s7 + $0xc] sm:$0xf] }
  0xed   : > { %1238 = vmatmul.msk.f32.vlgmr.msra.gmra.mxu0 %vm562_vm15, %v537_v38  ;;  %1242 = vmatmul.msk.f32.vlgmr.msra.gmra.mxu1 %vm562_vm15, %v537_v38 }
  0xf5   : > { %1239 = vmatmul.msk.f32.gmra.mxu0 %vm562_vm15, %v538_v41  ;;  %1243 = vmatmul.msk.f32.gmra.mxu1 %vm562_vm15, %v538_v41  ;;  %v1264_v41 = vld [vmem:[%s2151_s7 + $0x18] sm:$0xf] }
  0xfd   : > { %1240 = vmatmul.msk.f32.gmra.mxu0 %vm562_vm15, %v539_v42  ;;  %1244 = vmatmul.msk.f32.gmra.mxu1 %vm562_vm15, %v539_v42  ;;  %vm959_vm15 = vcmask 785408  }
 0x16a   : > { %v594_v44 = vpop.f32.mrf.mxu0  ;;  %v620_v45 = vpop.f32.mrf.mxu1 }
 0x16b   : > { %v595_v57 = vadd.f32 %v594_v44, %v546_v50  ;;  %v621_v58 = vadd.f32 %v620_v45, %v546_v50 }
 0x16d   : > { %v629_v63 = vmax.f32 %v595_v57, 0.0  ;;  %v630_v0 = vmax.f32 %v621_v58, 0.0 }
 0x172   : > { %v597_v47 = vpop.f32.mrf.mxu0  ;;  %v623_v48 = vpop.f32.mrf.mxu1 }
 0x173   : > { %v598_v53 = vadd.f32 %v597_v47, %v551_v46  ;;  %v624_v54 = vadd.f32 %v623_v48, %v551_v46  ;;  %v1258_v46 = vld [vmem:[%s2151_s7 + $0x10] sm:$0xf]  ;;  %v1261_v47 = vld [vmem:[%s2151_s7 + $0x14] sm:$0xf] }
 0x175   : > { %v631_v61 = vmax.f32 %v598_v53, 0.0  ;;  %v632_v62 = vmax.f32 %v624_v54, 0.0 }
 0x17a   : > { %v600_v51 = vpop.f32.mrf.mxu0  ;;  %v626_v52 = vpop.f32.mrf.mxu1 }
 0x17b   : > { %v601_v55 = vadd.f32 %v600_v51, %v556_v49  ;;  %v627_v56 = vadd.f32 %v626_v52, %v556_v49  ;;  %v1267_v51 = vld [vmem:[%s2151_s7 + $0x1c] sm:$0xf] }
 0x17d   : > { %v633_v59 = vmax.f32 %v601_v55, 0.0  ;;  %v634_v60 = vmax.f32 %v627_v56, 0.0  ;;  %v1270_v56 = vld [vmem:[%s2151_s7 + $0x20] sm:$0xf] }
 0x17f   : > { %659 = vmatpush.msra.mxu2 %v633_v59  ;;  %679 = vmatpush.msra.mxu3 %v634_v60 }
 0x181   : > { %660 = vmatpush.msra.mxu2 %v631_v61  ;;  %680 = vmatpush.msra.mxu3 %v632_v62 }
 0x183   : > { %661 = vmatpush.msra.mxu2 %v629_v63  ;;  %681 = vmatpush.msra.mxu3 %v630_v0 }
 0x184   : > { %1245 = vmatmul.msk.f32.vlgmr.msra.gmra.mxu2 %vm642_vm0, %v635_v1  ;;  %1246 = vmatmul.msk.f32.vlgmr.msra.gmra.mxu3 %vm642_vm0, %v635_v1  ;;  %vm814_vm0 = vcmask 1031168  }
 0x207   : > { %v663_v11 = vpop.f32.mrf.mxu2  ;;  %v683_v12 = vpop.f32.mrf.mxu3 }
 0x208   : > { %v664_v13 = vadd.f32 %v663_v11, %v640_v10  ;;  %v684_v14 = vadd.f32 %v683_v12, %v640_v10 }
 0x20a   : > { %v719_v15 = vsel %vm705_vm9, 0.0, %v664_v13  ;;  %v720_v16 = vsel %vm712_vm10, 0.0, %v684_v14 }
 0x20b   : > { %747 = vrot.lane.b32.xlu2 %v720_v16, %s1650_s28  ;;  %847 = vrot.lane.b32.xlu0 %v719_v15, %s1651_s23  ;;  %v739_v17 = vsel %vm734_vm11, %v719_v15, 0.0 }
 0x20c   : > { %745 = vrot.lane.b32.xlu1 %v719_v15, %s1650_s28  ;;  %1250 = vmatpush.msk.msrb.mxu3 %vm755_vm12, %v739_v17 }
 0x20d   : > { %1251 = vmatmul.msk.f32.vlgmr.msrb.gmra.mxu3 %vm751_vm13, %v740_v19 }
 0x213   : > { %812 = vrot.lane.b32.xlu2 %v720_v16, %s1652_s24  ;;  %957 = vrot.lane.b32.xlu0 %v720_v16, %s1653_s8 }
 0x214   : > { %810 = vrot.lane.b32.xlu1 %v719_v15, %s1652_s24  ;;  %s2153_s24 = sld [smem:[#allocation28_spill]] }
 0x21a   : > { %s1507_s26 = scalar_lea.hbm %s2153_s24, 16 }
 0x21b   : > { %955 = vrot.lane.b32.xlu2 %v719_v15, %s1653_s8  ;;  %994 = vrot.lane.b32.xlu0 %v719_v15, %s1654_s0  ;;  %s1085_s8 = scalar_lea.hbm %s2153_s24, %s1275_s9 }
 0x21c   : > { %849 = vrot.lane.b32.xlu1 %v720_v16, %s1651_s23  ;;  %s1089_s19 = sshll.u32 %s1085_s8, 4  ;;  %s1090_s19 = int_to_ptr.hbm [resolvable:$true] %s1089_s19 }
 0x21d   : > { %s1501_s11 = sshra.s32 %s1090_s19, 4  ;;  %s1502_s11 = int_to_ptr.hbm [resolvable:$true] %s1501_s11 }
 0x21e   : > { %s1503_s30 = scalar_lea.hbm %s1502_s11, 4  ;;  %p1508_p12 = scmp.lt.s32.totalorder %s1502_s11, %s2153_s24 }
 0x21f   : > { %p1504_p9 = scmp.ne.s32.totalorder %s1502_s11, %s1503_s30  ;;  %p1509_p5 = scmp.lt.s32.totalorder %s1507_s26, %s1503_s30 }
 0x221   : > { %p1505_p10 = pnand %p1504_p9, %p1827_p13  ;;  %p1510_p4 = por %p1509_p5, %p1508_p12 }
 0x223   : > { %888 = vrot.lane.b32.xlu2 %v720_v16, %s1655_s25  ;;  %920 = vrot.lane.b32.xlu0 %v720_v16, %s1656_s10  ;;  %p1506_p11 = pneg %p1505_p10 }
 0x224   : > { %886 = vrot.lane.b32.xlu1 %v719_v15, %s1655_s25  ;;  %s455_s25 = scalar_lea.vmem [#allocation8], %s1234_s12 }
 0x225   : > { %p1511_p0 = pnand %p1510_p4, %p1506_p11 }
 0x22b   : > { %918 = vrot.lane.b32.xlu2 %v719_v15, %s1656_s10  ;;  %1066 = vperm.xlu0 %1426, %v1063_v18   ;;  %s1087_s10 = sshll.u32 %s455_s25, 4  ;;  %s1088_s10 = int_to_ptr.vmem [resolvable:$true] %s1087_s10 }
 0x22c   : > { %996 = vrot.lane.b32.xlu1 %v720_v16, %s1654_s0 }
 0x233   : > { %1028 = vrot.lane.b32.xlu2 %v720_v16, %s1657_s27 }
 0x234   : > { %1026 = vrot.lane.b32.xlu1 %v719_v15, %s1657_s27 }
 0x265   : > { %v748_v20 = vpop.permute.xlu2 %747 }
 0x26d   : > { %v813_v21 = vpop.permute.xlu2 %812 }
 0x275   : > { %v956_v26 = vpop.permute.xlu2 %955 }
 0x27d   : > { %v848_v22 = vpop.permute.xlu0 %847  ;;  %v889_v35 = vpop.permute.xlu2 %888 }
 0x27e   : > { %v746_v23 = vpop.permute.xlu1 %745 }
 0x27f   : > { %v750_v25 = vsel %vm749_vm14, %v746_v23, %v748_v20 }
 0x280   : > { %1248 = vmatpush.msk.msrb.mxu2 %vm755_vm12, %v750_v25 }
 0x281   : > { %1249 = vmatmul.msk.f32.vlgmr.msrb.gmra.mxu2 %vm751_vm13, %v1247_v24 }
 0x285   : > { %v958_v28 = vpop.permute.xlu0 %957  ;;  %v919_v42 = vpop.permute.xlu2 %918 }
 0x286   : > { %v960_v29 = vsel %vm959_vm15, %v956_v26, %v958_v28  ;;  %v811_v30 = vpop.permute.xlu1 %810 }
 0x287   : > { %v962_v31 = vsel %vm734_vm11, %v960_v29, 0.0  ;;  %v815_v32 = vsel %vm814_vm0, %v811_v30, %v813_v21 }
 0x288   : > { %v817_v33 = vsel %vm806_vm1, %v815_v32, 0.0 }
 0x289   : > { %1253 = vmatpush.msk.msra.mxu2 %vm755_vm12, %v817_v33 }
 0x28a   : > { %1254 = vmatmul.msk.f32.vlgmr.msra.gmra.mxu2 %vm751_vm13, %v1252_v34 }
 0x28b   : > { %1265 = vmatpush.msk.msrb.mxu2 %vm755_vm12, %v962_v31 }
 0x28d   : > { %v995_v36 = vpop.permute.xlu0 %994  ;;  %v1029_v53 = vpop.permute.xlu2 %1028 }
 0x28e   : > { %v850_v37 = vpop.permute.xlu1 %849 }
 0x28f   : > { %v852_v38 = vsel %vm851_vm2, %v848_v22, %v850_v37 }
 0x290   : > { %v854_v40 = vsel %vm734_vm11, %v852_v38, 0.0  ;;  %v801_v59 = vpop.f32.mrf.mxu3 }
 0x291   : > { %1256 = vmatpush.msk.msra.mxu3 %vm755_vm12, %v854_v40 }
 0x292   : > { %1257 = vmatmul.msk.f32.vlgmr.msra.gmra.mxu3 %vm751_vm13, %v1255_v39  ;;  %1266 = vmatmul.msk.f32.vlgmr.msrb.gmra.mxu2 %vm751_vm13, %v1264_v41 }
 0x295   : > { %v921_v43 = vpop.permute.xlu0 %920 }
 0x296   : > { %v923_v44 = vsel %vm922_vm3, %v919_v42, %v921_v43  ;;  %v887_v45 = vpop.permute.xlu1 %886 }
 0x297   : > { %v891_v48 = vsel %vm890_vm4, %v887_v45, %v889_v35  ;;  %v925_v49 = vsel %vm806_vm1, %v923_v44, 0.0 }
 0x298   : > { %1259 = vmatpush.msk.msrb.mxu0 %vm755_vm12, %v891_v48  ;;  %1262 = vmatpush.msk.msrb.mxu1 %vm755_vm12, %v925_v49 }
 0x299   : > { %1260 = vmatmul.msk.f32.vlgmr.msrb.gmra.mxu0 %vm751_vm13, %v1258_v46  ;;  %1263 = vmatmul.msk.f32.vlgmr.msrb.gmra.mxu1 %vm751_vm13, %v1261_v47 }
 0x29d   : > { %v1067_v12 = vpop.permute.xlu0 %1066 }
 0x29e   : > { %v997_v50 = vpop.permute.xlu1 %996 }
 0x29f   : > { %v999_v52 = vsel %vm998_vm5, %v995_v36, %v997_v50 }
 0x2a0   : > { %1268 = vmatpush.msk.msrb.mxu3 %vm755_vm12, %v999_v52 }
 0x2a1   : > { %1269 = vmatmul.msk.f32.vlgmr.msrb.gmra.mxu3 %vm751_vm13, %v1267_v51 }
 0x2a6   : > { %v1027_v54 = vpop.permute.xlu1 %1026 }
 0x2a7   : > { %v1031_v55 = vsel %vm1030_vm6, %v1027_v54, %v1029_v53 }
 0x2a8   : > { %v1033_v57 = vsel %vm806_vm1, %v1031_v55, 0.0 }
 0x2a9   : > { %1271 = vmatpush.msk.msra.mxu0 %vm755_vm12, %v1033_v57 }
 0x2aa   : > { %1272 = vmatmul.msk.f32.vlgmr.msra.gmra.mxu0 %vm751_vm13, %v1270_v56 }
 0x304   : > { %v775_v58 = vpop.f32.mrf.mxu2 }
 0x305   : > { %v802_v60 = vadd.f32 %v801_v59, %v775_v58 }
 0x30d   : > { %v843_v61 = vpop.f32.mrf.mxu2 }
 0x30e   : > { %v846_v62 = vadd.f32 %v843_v61, %v802_v60 }
 0x315   : > { %v880_v63 = vpop.f32.mrf.mxu3  ;;  %v988_v6 = vpop.f32.mrf.mxu2 }
 0x316   : > { %v883_v0 = vadd.f32 %v880_v63, %v846_v62  ;;  %v914_v1 = vpop.f32.mrf.mxu0  ;;  %v951_v4 = vpop.f32.mrf.mxu1 }
 0x318   : > { %v917_v2 = vadd.f32 %v914_v1, %v883_v0 }
 0x31a   : > { %v954_v5 = vadd.f32 %v951_v4, %v917_v2 }
 0x31c   : > { %v991_v7 = vadd.f32 %v988_v6, %v954_v5 }
 0x324   : > { %v1022_v8 = vpop.f32.mrf.mxu3 }
 0x325   : > { %v1025_v9 = vadd.f32 %v1022_v8, %v991_v7 }
 0x327   : > { %v1059_v10 = vpop.f32.mrf.mxu0 }
 0x328   : > { %v1062_v11 = vadd.f32 %v1059_v10, %v1025_v9 }
 0x32a   : > { %v1069_v13 = vadd.f32 %v1067_v12, %v1062_v11 }
 0x32c   : > { %v1070_v14 = vadd.f32 %v1069_v13, %v1917_v3 }
 0x32e   : > { %1071 = vst [vmem:[%s455_s25] sm:$0xf] %v1070_v14 }
 0x32f   : > { %1514 = shalt.err (!%p1511_p0)
}
 0x330   : > { %1282 = dma.vmem_to_hbm [thread:$0]  (%p1827_p13), %s1088_s10, 64, %s1090_s19, %s1073_s18  }
 0x331 PF: > { %s2155_s6 = sld [smem:[#allocation12_spill]]  ;;  %p1296_p3 = scmp.ge.s32.totalorder %s1641_s22, 2 }
 0x333   : > { %p1292_p7 = pnand %p1296_p3, %p1832_p2 }
 0x335   : > { %p1293_p6 = pneg %p1292_p7 }
 0x337   : > { %s1101_s12 = sand.u32 1, %s2155_s6  }
 0x338   : > { %s1102_s9 = scalar_lea.sflag [#allocation5], %s1101_s12 }
 0x339   : > { %1580 = dma.done.wait (%p1293_p6), %s1102_s9, 64  }
 0x33a   : > { %1582 = vsyncadd (%p1293_p6), %s1102_s9, 4294967232  ;;  %s28_s22 = sadd.s32 1, %s1641_s22   ;;  %s2158_s30 = sld [smem:[#allocation13_spill]] }
 0x33b   : > { %p2046_p8 = scmp.ge.s32.totalorder %s28_s22, 6   ;;  %s2159_s10 = sld [smem:[#allocation14_spill]] }
 0x33c   : > { %s2160_s11 = sld [smem:[#allocation20_spill]]  ;;  %s2166_s12 = smov %s1605_s13 }
 0x33d   : > { %s2161_s23 = sld [smem:[#allocation15_spill]]  ;;  %s2167_s13 = smov %s1609_s14 }
 0x33e   : > { %s2162_s17 = sld [smem:[#allocation19_spill]]  ;;  %s2168_s14 = smov %s1887_s20 }
 0x33f   : > { %s2163_s18 = sld [smem:[#allocation16_spill]]  ;;  %s2169_s15 = smov %s1617_s16 }
 0x340   : > { %s2164_s8 = sld [smem:[#allocation17_spill]]  ;;  %s2171_s19 = smov %s1637_s21 }
 0x341   : > { %s2165_s0 = sld [smem:[#allocation18_spill]] }
 0x343   : > { %s2170_s16 = smov %s2161_s23  ;;  %27 = sbr.rel (!%p2046_p8) target bundleno = 19 (0x13), region = 125 }
 0x346   : > { %s2172_s20 = smov %s2164_s8 }
 0x347   : > { %s2173_s21 = smov %s2165_s0 }
 0x348   :  { %1108 = vsyncpa [#allocation4], 1 }
 0x349   :  { %1110 = vsyncpa [#allocation4 + $0x1], 1 }
 0x34a   :  { %1111 = vsyncpa [#allocation7], 1 }
 0x34b   :  { %1113 = vsyncpa [#allocation7 + $0x1], 1 }
 0x34c   :  { %1114 = vsyncpa [#allocation5], 1 }
 0x34d   :  { %1116 = vsyncpa [#allocation5 + $0x1], 1 }

</bundles_post_ra>
